<compile_context>
chip_gen: v7x
topology: tpu7x:2x2x1
jax: 0.10.0
libtpu: 0.0.40
codegen_flags: <defaults>
</compile_context>

<pallas_src>
import copy
import math

import numpy as np
import jax
import jax.numpy as jnp
from jax.experimental import pallas as pl
from jax.experimental.pallas import tpu as pltpu  # noqa: F401  (TPU backend)

C_PAD = 128          # lane-dense logit / output width (6 real logit columns)
NEG_BIG = -1e30

# merge-type codes and their logit-column windows inside the fused head table
T_EE, T_PP, T_EP = 0, 1, 2
COL_START = {T_EE: 0, T_PP: 3, T_EP: 5}
N_CLASSES = {T_EE: 3, T_PP: 2, T_EP: 1}


# ----------------------- symbolic semantic classes (host) --------------------
class E:
    def __init__(self, entity):
        self.entity = [entity]

    def add_E_and(self, E0):
        right_E = copy.deepcopy(E0)
        self.entity = ['('] + self.entity + [','] + right_E.entity + [')']

    def add_E_ex(self, E0):
        right_E = copy.deepcopy(E0)
        self.entity = ['exclude', '('] + self.entity + [','] + right_E.entity + [')']

    def add_E_in(self, E0):
        right_E = copy.deepcopy(E0)
        self.entity = ['intersection', '('] + self.entity + [','] + right_E.entity + [')']

    def add_P(self, P0):
        left_P = copy.deepcopy(P0)
        self.entity = left_P.predicate + self.entity + left_P.postfix


class P:
    def __init__(self, predicate):
        self.predicate = [predicate, '(']
        self.postfix = [')']

    def add_P_order(self, P0):
        right_p = copy.deepcopy(P0)
        self.predicate = self.predicate + right_p.predicate
        self.postfix = self.postfix + right_p.postfix

    def add_P_reorder(self, P0):
        right_p = copy.deepcopy(P0)
        self.predicate = right_p.predicate + self.predicate
        self.postfix = self.postfix + right_p.postfix


# ------------------------------ Pallas kernel --------------------------------
def _semantic_heads_kernel(x_ref, w_ref, tcode_ref, out_ref):
    """x_ref:     (N, Hp)  f32   parent representations; col H holds the 1.0 bias feature
       w_ref:     (Hp, 128) f32  fused head table: col c = weights of logit c (bias in row H),
                                 columns 6..127 are zero
       tcode_ref: (N, 1)   int32 merge-type code per row (0=E+E, 1=P+P, 2=E+P)
       out_ref:   (N, 128) f32   lane0 = argmax action, lane1 = normalized entropy,
                                 lane2 = log_prob(argmax)."""
    x = x_ref[...]
    w = w_ref[...]
    t = tcode_ref[...]                                            # (N, 1)
    N, C = out_ref.shape
    lane = jax.lax.broadcasted_iota(jnp.int32, (N, C), dimension=1)

    # fused logits of all three heads in one MXU pass (f32 accumulate)
    scores = jnp.dot(x, w, preferred_element_type=jnp.float32)    # (N, 128)

    # per-row head window derived from the type code
    start = jnp.where(t == T_EE, 0, jnp.where(t == T_PP, 3, 5))   # (N, 1)
    ncls = jnp.where(t == T_EE, 3, jnp.where(t == T_PP, 2, 1))    # (N, 1)
    valid = jnp.logical_and(lane >= start, lane < start + ncls)

    # masked softmax over each row's class window
    ms = jnp.where(valid, scores, NEG_BIG)
    m = jnp.max(ms, axis=-1, keepdims=True)                       # (N, 1)
    e = jnp.exp(ms - m)                                           # exactly 0 outside window
    z = jnp.sum(e, axis=-1, keepdims=True)
    inv_z = pl.reciprocal(z)                                      # exact EUP reciprocal
    logz = jnp.log(z)
    probs = e * inv_z
    logp = (scores - m) - logz                                    # probs==0 masks invalid lanes

    entropy = -jnp.sum(probs * logp, axis=-1, keepdims=True)
    nf = ncls.astype(jnp.float32)
    norm_ent = jnp.where(ncls > 1,
                         entropy / jnp.log(jnp.maximum(nf, 2.0)),
                         jnp.float32(0.0))                        # exact 0 when K == 1

    # argmax (first occurrence, matching torch.argmax) and its log-prob
    lane_f = lane.astype(jnp.float32)
    is_max = jnp.logical_and(valid, ms >= m)
    amax = jnp.min(jnp.where(is_max, lane_f, jnp.float32(C)), axis=-1, keepdims=True)
    action = amax - start.astype(jnp.float32)
    chosen_logp = -logz                                           # score at argmax == m

    out = jnp.where(lane == 0, action, jnp.float32(0.0))
    out = jnp.where(lane == 1, norm_ent, out)
    out = jnp.where(lane == 2, chosen_logp, out)
    out_ref[...] = out


@jax.jit
def _semantic_heads(rep, tcode, w_t):
    """rep: (n_bucket, H) f32 on device; tcode: (n_bucket, 1) int32; w_t: (H_pad, 128) f32.
    Bias/zero padding of the feature axis happens on device, under this jit."""
    n_bucket, H = rep.shape
    Hp = w_t.shape[0]
    x = jnp.concatenate(
        [rep.astype(jnp.float32),
         jnp.ones((n_bucket, 1), jnp.float32),                    # folded bias feature
         jnp.zeros((n_bucket, Hp - H - 1), jnp.float32)], axis=-1)
    return pl.pallas_call(                                        # grid-less: one invocation,
        _semantic_heads_kernel,                                   # whole-array VMEM blocks
        out_shape=jax.ShapeDtypeStruct((n_bucket, C_PAD), jnp.float32),
    )(x, w_t, tcode)


def _bucket(n):
    """Pad row counts to fixed power-of-two buckets (>= 8) to avoid per-shape recompiles."""
    b = 8
    while b < n:
        b *= 2
    return b


# --------------------------- module equivalent --------------------------------
class SolverPallas:
    """Pallas/JAX equivalent of Solver (eval-mode action selection)."""

    def __init__(self, hidden_dim, output_lang, entity_list=[], predicate_list=[],
                 key=None):
        self.hidden_dim = hidden_dim
        self.output_lang = output_lang
        self.entity_list = entity_list
        self.predicate_list = predicate_list
        self.training = False
        # TODO(synk): training-mode relaxed Gumbel-softmax sampling
        # (Categorical.rsample with tau_weights / straight_through) is not
        # implemented; only the deterministic eval-mode argmax path is.

        if key is None:
            key = jax.random.PRNGKey(0)
        k = jax.random.split(key, 6)
        bound = 1.0 / math.sqrt(hidden_dim)

        def linear(kw, kb, out_features):
            w = jax.random.uniform(kw, (out_features, hidden_dim), jnp.float32,
                                   -bound, bound)
            b = jax.random.uniform(kb, (out_features,), jnp.float32, -bound, bound)
            return np.asarray(w), np.asarray(b)

        # same parameterization as nn.Linear(hidden_dim, {3, 2, 1})
        self.W_EE, self.b_EE = linear(k[0], k[1], 3)
        self.W_PP, self.b_PP = linear(k[2], k[3], 2)
        self.W_EP, self.b_EP = linear(k[4], k[5], 1)

        H = hidden_dim
        self.H = H
        self.H_pad = ((H + 1 + 127) // 128) * 128      # +1 for the folded bias row
        # fused, transposed head table: column c = weight vector of logit c, row H = bias
        w_t = np.zeros((self.H_pad, C_PAD), np.float32)
        w_t[:H, 0:3] = self.W_EE.T
        w_t[:H, 3:5] = self.W_PP.T
        w_t[:H, 5:6] = self.W_EP.T
        w_t[H, 0:3] = self.b_EE
        w_t[H, 3:5] = self.b_PP
        w_t[H, 5] = self.b_EP[0]
        self.w_t = jnp.asarray(w_t)

    def init_semantic_class(self, span2output_token):
        span2semantic = {}
        for span in span2output_token:
            span_position = span[0]
            output_token = span[1]
            assert output_token in self.entity_list + self.predicate_list
            if output_token in self.entity_list:
                span_semantic = E(output_token)
            else:
                span_semantic = P(output_token)
            span2semantic[str(span_position)] = span_semantic
        return span2semantic

    def forward(self, pair, span2output_token, parent_child_spans, span2repre,
                relaxed=False, tau_weights=None, straight_through=False, noise=None,
                eval_actions=None, eval_sr_actions=None, eval_swr_actions=None,
                debug_info=None):
        span2semantic = self.init_semantic_class(span2output_token)

        # --- pass 1: resolve merge types (child classes alone fix the parent class)
        span_is_E = {str(s[0]): (s[1] in self.entity_list) for s in span2output_token}
        merges = []
        for parent_child_span in parent_child_spans:
            parent_span = parent_child_span[0]
            child0_span = parent_child_span[1][0]
            child1_span = parent_child_span[1][1]
            assert child0_span[1] < child1_span[0]
            c0_is_E = span_is_E[str(child0_span)]
            c1_is_E = span_is_E[str(child1_span)]
            if c0_is_E and c1_is_E:
                t = T_EE
            elif (not c0_is_E) and (not c1_is_E):
                t = T_PP
            else:
                t = T_EP
            span_is_E[str(parent_span)] = (t != T_PP)
            merges.append((parent_span, child0_span, child1_span, t))

        # --- hot path: every merge decision of this forward in ONE Pallas call ---
        n = len(merges)
        actions = norm_ents = logps = None
        if n > 0:
            n_bucket = _bucket(n)
            # assemble on device: no per-merge D2H sync, one contiguous (n, H) buffer
            rows = [jnp.asarray(span2repre[str(ps)], jnp.float32).reshape(1, -1)
                    for (ps, _, _, _) in merges]
            rep = jnp.concatenate(rows, axis=0)
            if n_bucket > n:
                rep = jnp.concatenate(
                    [rep, jnp.zeros((n_bucket - n, self.H), jnp.float32)], axis=0)
            tcodes = np.full((n_bucket, 1), T_EP, np.int32)        # harmless pad rows
            for i, (_, _, _, t) in enumerate(merges):
                tcodes[i, 0] = t
            out = _semantic_heads(rep, jnp.asarray(tcodes), self.w_t)
            out = np.asarray(jax.block_until_ready(out))           # single D2H readback
            actions = np.rint(out[:n, 0]).astype(np.int64)
            norm_ents = out[:n, 1]
            logps = out[:n, 2]

        # --- pass 2: symbolic merge replay (host-side, mirrors semantic_merge) ---
        semantic_normalized_entropy = []
        semantic_log_prob = []
        parent_span = None
        for i, (parent_span, child0_span, child1_span, t) in enumerate(merges):
            child0_semantic = span2semantic[str(child0_span)]
            child1_semantic = span2semantic[str(child1_span)]
            a = int(actions[i])
            if t == T_EE:
                parent_semantic = copy.deepcopy(child0_semantic)
                if a == 0:
                    parent_semantic.add_E_and(child1_semantic)
                elif a == 1:
                    parent_semantic.add_E_ex(child1_semantic)
                else:
                    parent_semantic.add_E_in(child1_semantic)
            elif t == T_PP:
                parent_semantic = copy.deepcopy(child0_semantic)
                if a == 0:
                    parent_semantic.add_P_order(child1_semantic)
                else:
                    parent_semantic.add_P_reorder(child1_semantic)
            else:
                assert a == 0
                if isinstance(child0_semantic, P) and isinstance(child1_semantic, E):
                    parent_semantic = copy.deepcopy(child1_semantic)
                    parent_semantic.add_P(child0_semantic)
                else:
                    parent_semantic = copy.deepcopy(child0_semantic)
                    parent_semantic.add_P(child1_semantic)
            span2semantic[str(parent_span)] = parent_semantic
            semantic_normalized_entropy.append(float(norm_ents[i]))
            semantic_log_prob.append(-float(logps[i]))

        if len(semantic_normalized_entropy) > 0:
            normalized_entropy = (sum(semantic_normalized_entropy)
                                  / len(semantic_normalized_entropy))
        else:
            normalized_entropy = 0.0
        semantic_log_prob = sum(semantic_log_prob)
        if parent_child_spans == []:
            assert len(span2output_token) == 1
            parent_span = span2output_token[0][0]
        semantic_rl_infos = [normalized_entropy, semantic_log_prob, span2semantic,
                             parent_span]
        return semantic_rl_infos


# ------------------------ pure-numpy reference ---------------------------------
def _softmax_np(s):
    s = np.asarray(s, np.float32)
    m = s.max()
    e = np.exp(s - m)
    return e / e.sum()


def reference_forward(model, pair, span2output_token, parent_child_spans, span2repre):
    """Pure-numpy mirror of Solver.forward (eval-mode argmax actions)."""
    span2semantic = {}
    for span in span2output_token:
        tok = span[1]
        span2semantic[str(span[0])] = E(tok) if tok in model.entity_list else P(tok)

    nes, nlps = [], []
    parent_span = None
    for parent_child_span in parent_child_spans:
        parent_span = parent_child_span[0]
        child0_span, child1_span = parent_child_span[1][0], parent_child_span[1][1]
        child0 = span2semantic[str(child0_span)]
        child1 = span2semantic[str(child1_span)]
        r = np.asarray(span2repre[str(parent_span)], np.float32).reshape(-1)
        if isinstance(child0, E) and isinstance(child1, E):
            W, b = model.W_EE, model.b_EE
        elif isinstance(child0, P) and isinstance(child1, P):
            W, b = model.W_PP, model.b_PP
        else:
            W, b = model.W_EP, model.b_EP
        probs = _softmax_np(W @ r + b)
        a = int(np.argmax(probs))
        ent = -float(np.sum(probs * np.log(probs)))
        nes.append(ent / (math.log(len(probs)) + 1e-17))
        nlps.append(-float(np.log(probs[a])))
        if isinstance(child0, E) and isinstance(child1, E):
            parent = copy.deepcopy(child0)
            [parent.add_E_and, parent.add_E_ex, parent.add_E_in][a](child1)
        elif isinstance(child0, P) and isinstance(child1, P):
            parent = copy.deepcopy(child0)
            [parent.add_P_order, parent.add_P_reorder][a](child1)
        else:
            assert a == 0
            if isinstance(child0, P) and isinstance(child1, E):
                parent = copy.deepcopy(child1)
                parent.add_P(child0)
            else:
                parent = copy.deepcopy(child0)
                parent.add_P(child1)
        span2semantic[str(parent_span)] = parent

    normalized_entropy = sum(nes) / len(nes) if nes else 0.0
    log_prob = sum(nlps)
    if parent_child_spans == []:
        assert len(span2output_token) == 1
        parent_span = span2output_token[0][0]
    return [normalized_entropy, log_prob, span2semantic, parent_span]


def _sem_equal(a, b):
    if type(a) is not type(b):
        return False
    if isinstance(a, E):
        return a.entity == b.entity
    return a.predicate == b.predicate and a.postfix == b.postfix


# ---------------------------------- main ---------------------------------------
if __name__ == "__main__":
    hidden_dim = 32
    entity_list = ["texas", "city", "river"]
    predicate_list = ["capital", "largest", "loc"]
    output_lang = None   # stored by the module, never used in forward

    key = jax.random.PRNGKey(0)
    k_model, k_repre = jax.random.split(key)
    model = SolverPallas(hidden_dim, output_lang, entity_list, predicate_list,
                         key=k_model)

    # small deterministic problem: 4 leaf spans, 3 merges (P+E, E+E, P+E)
    span2output_token = [
        [[0, 0], "capital"],
        [[1, 1], "texas"],
        [[2, 2], "largest"],
        [[3, 3], "city"],
    ]
    parent_child_spans = [
        [[2, 3], [[2, 2], [3, 3]]],   # P + E
        [[1, 3], [[1, 1], [2, 3]]],   # E + E
        [[0, 3], [[0, 0], [1, 3]]],   # P + E
    ]
    rep_keys = jax.random.split(k_repre, len(parent_child_spans))
    span2repre = {str(pcs[0]): jax.random.normal(rk, (1, hidden_dim), jnp.float32)
                  for rk, pcs in zip(rep_keys, parent_child_spans)}

    ne, lp, span2sem, parent_span = model.forward(
        None, span2output_token, parent_child_spans, span2repre)

    ref_ne, ref_lp, ref_sem, ref_parent = reference_forward(
        model, None, span2output_token, parent_child_spans, span2repre)

    assert parent_span == ref_parent, (parent_span, ref_parent)
    assert abs(ne - ref_ne) < 1e-4, (ne, ref_ne)
    assert abs(lp - ref_lp) < 1e-4, (lp, ref_lp)
    assert set(span2sem.keys()) == set(ref_sem.keys())
    for sk in span2sem:
        assert _sem_equal(span2sem[sk], ref_sem[sk]), sk
    print("KERNEL_OK")
</pallas_src>

<mosaic_0001>
module attributes {stable_mosaic.version = 11 : i64} {
  func.func @_semantic_heads_kernel(%arg0: memref<8x128xf32, #tpu.memory_space<vmem>>, %arg1: memref<128x128xf32, #tpu.memory_space<vmem>>, %arg2: memref<8x1xi32, #tpu.memory_space<vmem>>, %arg3: memref<8x128xf32, #tpu.memory_space<vmem>>) attributes {dimension_semantics = [], scalar_prefetch = 0 : i64, scratch_operands = 0 : i64, tpu.core_type = #tpu.core_type<tc>} {
    %c0 = arith.constant 0 : index
    %c0_0 = arith.constant 0 : index
    %0 = vector.load %arg0[%c0, %c0_0] : memref<8x128xf32, #tpu.memory_space<vmem>>, vector<8x128xf32>
    %c0_1 = arith.constant 0 : index
    %c0_2 = arith.constant 0 : index
    %1 = vector.load %arg1[%c0_1, %c0_2] : memref<128x128xf32, #tpu.memory_space<vmem>>, vector<128x128xf32>
    %c0_3 = arith.constant 0 : index
    %c0_4 = arith.constant 0 : index
    %2 = vector.load %arg2[%c0_3, %c0_4] : memref<8x1xi32, #tpu.memory_space<vmem>>, vector<8x1xi32>
    %3 = tpu.iota {dimensions = array<i32: 1>} : vector<8x128xi32>
    %cst = arith.constant dense<0.000000e+00> : vector<8x128xf32>
    %4 = tpu.matmul %0, %1, %cst {dimension_numbers = #tpu.dot_dimension_numbers<[1], [0], [0], [1], [0, 0, 1, 1], [], []>} : vector<8x128xf32>, vector<128x128xf32>, vector<8x128xf32> -> vector<8x128xf32>
    %c0_i32 = arith.constant 0 : i32
    %5 = vector.broadcast %c0_i32 : i32 to vector<8x1xi32>
    %6 = arith.cmpi eq, %2, %5 : vector<8x1xi32>
    %c1_i32 = arith.constant 1 : i32
    %7 = vector.broadcast %c1_i32 : i32 to vector<8x1xi32>
    %8 = arith.cmpi eq, %2, %7 : vector<8x1xi32>
    %c3_i32 = arith.constant 3 : i32
    %c5_i32 = arith.constant 5 : i32
    %9 = vector.broadcast %c3_i32 : i32 to vector<8x1xi32>
    %10 = vector.broadcast %c5_i32 : i32 to vector<8x1xi32>
    %11 = arith.select %8, %9, %10 : vector<8x1xi1>, vector<8x1xi32>
    %c0_i32_5 = arith.constant 0 : i32
    %12 = vector.broadcast %c0_i32_5 : i32 to vector<8x1xi32>
    %13 = arith.select %6, %12, %11 : vector<8x1xi1>, vector<8x1xi32>
    %c0_i32_6 = arith.constant 0 : i32
    %14 = vector.broadcast %c0_i32_6 : i32 to vector<8x1xi32>
    %15 = arith.cmpi eq, %2, %14 : vector<8x1xi32>
    %c1_i32_7 = arith.constant 1 : i32
    %16 = vector.broadcast %c1_i32_7 : i32 to vector<8x1xi32>
    %17 = arith.cmpi eq, %2, %16 : vector<8x1xi32>
    %c2_i32 = arith.constant 2 : i32
    %c1_i32_8 = arith.constant 1 : i32
    %18 = vector.broadcast %c2_i32 : i32 to vector<8x1xi32>
    %19 = vector.broadcast %c1_i32_8 : i32 to vector<8x1xi32>
    %20 = arith.select %17, %18, %19 : vector<8x1xi1>, vector<8x1xi32>
    %c3_i32_9 = arith.constant 3 : i32
    %21 = vector.broadcast %c3_i32_9 : i32 to vector<8x1xi32>
    %22 = arith.select %15, %21, %20 : vector<8x1xi1>, vector<8x1xi32>
    %23 = vector.broadcast %13 : vector<8x1xi32> to vector<8x128xi32>
    %24 = arith.cmpi sge, %3, %23 : vector<8x128xi32>
    %25 = arith.addi %13, %22 : vector<8x1xi32>
    %26 = vector.broadcast %25 : vector<8x1xi32> to vector<8x128xi32>
    %27 = arith.cmpi slt, %3, %26 : vector<8x128xi32>
    %28 = arith.andi %24, %27 : vector<8x128xi1>
    %cst_10 = arith.constant -1.000000e+30 : f32
    %29 = vector.broadcast %cst_10 : f32 to vector<8x128xf32>
    %30 = arith.select %28, %4, %29 : vector<8x128xi1>, vector<8x128xf32>
    %cst_11 = arith.constant dense<0xFF800000> : vector<8xf32>
    %31 = vector.multi_reduction <maximumf>, %30, %cst_11 [1] : vector<8x128xf32> to vector<8xf32>
    %32 = vector.shape_cast %31 : vector<8xf32> to vector<8x1xf32>
    %33 = vector.broadcast %32 : vector<8x1xf32> to vector<8x128xf32>
    %34 = arith.subf %30, %33 : vector<8x128xf32>
    %35 = math.exp %34 : vector<8x128xf32>
    %cst_12 = arith.constant dense<0.000000e+00> : vector<8xf32>
    %36 = vector.multi_reduction <add>, %35, %cst_12 [1] : vector<8x128xf32> to vector<8xf32>
    %37 = vector.shape_cast %36 : vector<8xf32> to vector<8x1xf32>
    %38 = tpu.reciprocal %37 : vector<8x1xf32> -> vector<8x1xf32>
    %39 = math.log %37 : vector<8x1xf32>
    %40 = vector.broadcast %38 : vector<8x1xf32> to vector<8x128xf32>
    %41 = arith.mulf %35, %40 : vector<8x128xf32>
    %42 = vector.broadcast %32 : vector<8x1xf32> to vector<8x128xf32>
    %43 = arith.subf %4, %42 : vector<8x128xf32>
    %44 = vector.broadcast %39 : vector<8x1xf32> to vector<8x128xf32>
    %45 = arith.subf %43, %44 : vector<8x128xf32>
    %46 = arith.mulf %41, %45 : vector<8x128xf32>
    %cst_13 = arith.constant dense<0.000000e+00> : vector<8xf32>
    %47 = vector.multi_reduction <add>, %46, %cst_13 [1] : vector<8x128xf32> to vector<8xf32>
    %48 = vector.shape_cast %47 : vector<8xf32> to vector<8x1xf32>
    %cst_14 = arith.constant 0.000000e+00 : f32
    %49 = vector.broadcast %cst_14 : f32 to vector<8x1xf32>
    %50 = arith.subf %49, %48 : vector<8x1xf32>
    %51 = arith.sitofp %22 : vector<8x1xi32> to vector<8x1xf32>
    %c1_i32_15 = arith.constant 1 : i32
    %52 = vector.broadcast %c1_i32_15 : i32 to vector<8x1xi32>
    %53 = arith.cmpi sgt, %22, %52 : vector<8x1xi32>
    %cst_16 = arith.constant 2.000000e+00 : f32
    %54 = vector.broadcast %cst_16 : f32 to vector<8x1xf32>
    %55 = arith.maximumf %51, %54 : vector<8x1xf32>
    %56 = math.log %55 : vector<8x1xf32>
    %57 = arith.divf %50, %56 : vector<8x1xf32>
    %cst_17 = arith.constant 0.000000e+00 : f32
    %58 = vector.broadcast %cst_17 : f32 to vector<8x1xf32>
    %59 = arith.select %53, %57, %58 : vector<8x1xi1>, vector<8x1xf32>
    %60 = arith.sitofp %3 : vector<8x128xi32> to vector<8x128xf32>
    %61 = vector.broadcast %32 : vector<8x1xf32> to vector<8x128xf32>
    %62 = arith.cmpf oge, %30, %61 : vector<8x128xf32>
    %63 = arith.andi %28, %62 : vector<8x128xi1>
    %cst_18 = arith.constant 1.280000e+02 : f32
    %64 = vector.broadcast %cst_18 : f32 to vector<8x128xf32>
    %65 = arith.select %63, %60, %64 : vector<8x128xi1>, vector<8x128xf32>
    %cst_19 = arith.constant dense<0x7F800000> : vector<8xf32>
    %66 = vector.multi_reduction <minimumf>, %65, %cst_19 [1] : vector<8x128xf32> to vector<8xf32>
    %67 = vector.shape_cast %66 : vector<8xf32> to vector<8x1xf32>
    %68 = arith.sitofp %13 : vector<8x1xi32> to vector<8x1xf32>
    %69 = arith.subf %67, %68 : vector<8x1xf32>
    %cst_20 = arith.constant 0.000000e+00 : f32
    %70 = vector.broadcast %cst_20 : f32 to vector<8x1xf32>
    %71 = arith.subf %70, %39 : vector<8x1xf32>
    %c0_i32_21 = arith.constant 0 : i32
    %72 = vector.broadcast %c0_i32_21 : i32 to vector<8x128xi32>
    %73 = arith.cmpi eq, %3, %72 : vector<8x128xi32>
    %cst_22 = arith.constant 0.000000e+00 : f32
    %74 = vector.shape_cast %69 : vector<8x1xf32> to vector<8x1xf32>
    %75 = vector.broadcast %74 : vector<8x1xf32> to vector<8x128xf32>
    %76 = vector.broadcast %cst_22 : f32 to vector<8x128xf32>
    %77 = arith.select %73, %75, %76 : vector<8x128xi1>, vector<8x128xf32>
    %c1_i32_23 = arith.constant 1 : i32
    %78 = vector.broadcast %c1_i32_23 : i32 to vector<8x128xi32>
    %79 = arith.cmpi eq, %3, %78 : vector<8x128xi32>
    %80 = vector.shape_cast %59 : vector<8x1xf32> to vector<8x1xf32>
    %81 = vector.broadcast %80 : vector<8x1xf32> to vector<8x128xf32>
    %82 = arith.select %79, %81, %77 : vector<8x128xi1>, vector<8x128xf32>
    %c2_i32_24 = arith.constant 2 : i32
    %83 = vector.broadcast %c2_i32_24 : i32 to vector<8x128xi32>
    %84 = arith.cmpi eq, %3, %83 : vector<8x128xi32>
    %85 = vector.shape_cast %71 : vector<8x1xf32> to vector<8x1xf32>
    %86 = vector.broadcast %85 : vector<8x1xf32> to vector<8x128xf32>
    %87 = arith.select %84, %86, %82 : vector<8x128xi1>, vector<8x128xf32>
    %c0_25 = arith.constant 0 : index
    %c0_26 = arith.constant 0 : index
    %88 = vector.load %arg3[%c0_25, %c0_26] : memref<8x128xf32, #tpu.memory_space<vmem>>, vector<8x128xf32>
    tpu.vector_store %arg3[%c0_25, %c0_26], %87 {strides = array<i32>} : memref<8x128xf32, #tpu.memory_space<vmem>>, vector<8x128xf32>,
    return
  }
}

</mosaic_0001>

<bundles_post_ra>
// kernel: _semantic_heads.1
= control target key start
LH: loop header
LB: loop body
LE: loop exit
PB: predicated region body
PF: predicated region fallthrough
CT: control target
= control target key end

     0   :  { %8 = vsyncpa [#allocation3], 0  ;;  %s413_s0 = inlined_call_operand.vmem [shape: f32[8,128], index: 0, kind: input, shape index: {}]   ;;  %s414_s1 = inlined_call_operand.hbm [shape: f32[128,128], index: 1, kind: input, shape index: {}]   ;;  %s415_s2 = inlined_call_operand.vmem [shape: s32[8,1], index: 2, kind: input, shape index: {}]   ;;  %s416_s3 = inlined_call_operand.hbm [shape: f32[8,128], index: 3, kind: output, shape index: {}]  }
   0x1   :  { %9 = vsyncpa [#allocation4], 0  ;;  %s348_s12 = smov [#allocation2]   ;;  %s300_s16 = scalar_lea.hbm %s414_s1, 2048 }
   0x2   :  { %s17_s13 = sshll.u32 %s348_s12, 4  ;;  %p301_p0 = scmp.ne.s32.totalorder %s414_s1, %s300_s16  ;;  %s18_s13 = int_to_ptr.vmem [resolvable:$true] %s17_s13 }
   0x3   :  { %p304_p1 = scmp.lt.u32.totalorder %s300_s16, %s414_s1 }
   0x5   :  { %p306_p2 = pnand %p304_p1, %p301_p0 }
   0x7   :  { %309 = shalt.err (!%p306_p2)
}
   0x8   :  { %s310_s21 = scalar_lea.vmem %s18_s13, 2048  ;;  %p315_p4 = scmp.lt.s32.totalorder %s18_s13, %s18_s13 }
   0x9   :  { %p311_p3 = scmp.ne.s32.totalorder %s18_s13, %s310_s21  ;;  %p316_p5 = scmp.lt.s32.totalorder %s310_s21, %s310_s21 }
   0xb   :  { %p317_p6 = por %p316_p5, %p315_p4 }
   0xd   :  { %p318_p7 = pnand %p317_p6, %p311_p3 }
   0xf   :  { %321 = shalt.err (!%p318_p7)
}
  0x10   :  { %s349_s22 = smov 128   ;;  %s350_s23 = smov 8  }
  0x11   :  { %23 = dma.hbm_to_vmem [thread:$0]  %s414_s1, 2048, %s18_s13, [#allocation3], %s349_s22, %s349_s22, %s350_s23  }
  0x12   :  { %344 = dma.done.wait [#allocation3], 2048  }
  0x13   :  { %345 = vsyncadd [#allocation3], 4294965248  ;;  %v351_v0 = vmov 0.0|0.0   ;;  %vm352_vm0 = vmmov 0   ;;  %v353_v1 = vmov 0.0   ;;  %v354_v2 = vmov 0  }
  0x14   :  { %254 = vmatprep.subr.bf16.mxu0 %v351_v0  ;;  %251 = vmatprep.mubr.msk.f32.mxu0 %vm352_vm0, %v353_v1  ;;  %v30_v3 = vld [vmem:[#allocation2] sm:$0xff]  ;;  %v31_v4 = vld [vmem:[#allocation2 + $0x8] sm:$0xff]  ;;  %v32_v5 = vld [vmem:[#allocation2 + $0x10] sm:$0xff]  ;;  %v355_v13 = vmov 5   ;;  %v356_v15 = vmov 1   ;;  %v47_v37 = vlaneseq }
  0x15   :  { %288 = vset.pattern.permute.xlu0 %v354_v2  ;;  %289 = vset.pattern.permute.xlu1 %v354_v2  ;;  %v255_v6 = vpack.c.bf16 %v31_v4, %v30_v3  ;;  %v33_v7 = vld [vmem:[#allocation2 + $0x18] sm:$0xff]  ;;  %v34_v9 = vld [vmem:[#allocation2 + $0x20] sm:$0xff]  ;;  %v35_v10 = vld [vmem:[#allocation2 + $0x28] sm:$0xff] }
  0x16   :  { %v258_v8 = vpack.c.bf16 %v33_v7, %v32_v5  ;;  %v46_v11 = vld [vmem:[%s415_s2] sm:$0xff]  ;;  %v261_v12 = vpack.c.bf16 %v35_v10, %v34_v9  ;;  %v36_v17 = vld [vmem:[#allocation2 + $0x30] sm:$0xff]  ;;  %v37_v18 = vld [vmem:[#allocation2 + $0x38] sm:$0xff]  ;;  %v48_v38 = vand.u32 127, %v47_v37 }
  0x17   :  { %256 = vmatpush3.bf16.msra.mxu0 %v255_v6  ;;  %vm119_vm1 = vcmp.eq.s32.totalorder %v46_v11, 0  ;;  %vm120_vm2 = vcmp.eq.s32.totalorder %v46_v11, 1  ;;  %v264_v22 = vpack.c.bf16 %v37_v18, %v36_v17  ;;  %v38_v23 = vld [vmem:[#allocation2 + $0x40] sm:$0xff]  ;;  %v39_v24 = vld [vmem:[#allocation2 + $0x48] sm:$0xff]  ;;  %v40_v26 = vld [vmem:[#allocation2 + $0x50] sm:$0xff] }
  0x18   :  { %257 = vmatprep.subr.bf16.mxu0 %v351_v0  ;;  %v121_v14 = vsel %vm120_vm2, 3, %v355_v13  ;;  %v123_v16 = vsel %vm120_vm2, 2, %v356_v15  ;;  %v267_v25 = vpack.c.bf16 %v39_v24, %v38_v23  ;;  %v41_v27 = vld [vmem:[#allocation2 + $0x58] sm:$0xff]  ;;  %v42_v29 = vld [vmem:[#allocation2 + $0x60] sm:$0xff]  ;;  %v43_v30 = vld [vmem:[#allocation2 + $0x68] sm:$0xff]  ;;  %v161_v47 = vcvt.s32.f32 %v48_v38 }
  0x19   :  { %v122_v19 = vsel %vm119_vm1, 0, %v121_v14  ;;  %v393_v20 = vsel %vm119_vm1, 3, %v123_v16  ;;  %v270_v28 = vpack.c.bf16 %v41_v27, %v40_v26  ;;  %v273_v31 = vpack.c.bf16 %v43_v30, %v42_v29  ;;  %v44_v32 = vld [vmem:[#allocation2 + $0x70] sm:$0xff]  ;;  %v45_v33 = vld [vmem:[#allocation2 + $0x78] sm:$0xff]  ;;  %v29_v35 = vld [vmem:[%s413_s0] sm:$0xff]  ;;  %s357_s0 = smov [#allocation5]  }
  0x1a   :  { %126 = vperm.xlu0 %288, %v122_v19   ;;  %v129_v21 = vadd.s32 %v393_v20, %v122_v19  ;;  %v276_v34 = vpack.c.bf16 %v45_v33, %v44_v32  ;;  %v167_v50 = vcvt.s32.f32 %v122_v19  ;;  %v153_v60 = vcvt.s32.f32 %v393_v20  ;;  %s193_s28 = sshll.u32 %s357_s0, 4  ;;  %s194_s28 = int_to_ptr.vmem [resolvable:$true] %s193_s28 }
  0x1b   :  { %259 = vmatpush3.bf16.msra.mxu0 %v258_v8  ;;  %vm154_vm8 = vcmp.gt.s32.totalorder %v393_v20, 1  ;;  %vm170_vm9 = vcmp.eq.s32.totalorder %v48_v38, 0  ;;  %vm177_vm10 = vcmp.eq.s32.totalorder %v48_v38, 1  ;;  %vm184_vm11 = vcmp.eq.s32.totalorder %v48_v38, 2  ;;  %s322_s29 = scalar_lea.vmem %s194_s28, 128  ;;  %p327_p9 = scmp.lt.s32.totalorder %s194_s28, %s194_s28 }
  0x1c   :  { %260 = vmatprep.subr.bf16.mxu0 %v351_v0  ;;  %v155_v61 = vmax.f32 %v153_v60, 2.0  ;;  %p323_p8 = scmp.ne.s32.totalorder %s194_s28, %s322_s29  ;;  %p328_p10 = scmp.lt.s32.totalorder %s322_s29, %s322_s29 }
  0x1e   :  { %131 = vperm.xlu0 %288, %v129_v21   ;;  %p329_p11 = por %p328_p10, %p327_p9 }
  0x1f   :  { %262 = vmatpush3.bf16.msra.mxu0 %v261_v12 }
  0x20   :  { %263 = vmatprep.subr.bf16.mxu0 %v351_v0  ;;  %p330_p12 = pnand %p329_p11, %p323_p8 }
  0x23   :  { %265 = vmatpush3.bf16.msra.mxu0 %v264_v22 }
  0x24   :  { %266 = vmatprep.subr.bf16.mxu0 %v351_v0 }
  0x27   :  { %268 = vmatpush3.bf16.msra.mxu0 %v267_v25 }
  0x28   :  { %269 = vmatprep.subr.bf16.mxu0 %v351_v0 }
  0x2b   :  { %271 = vmatpush3.bf16.msra.mxu0 %v270_v28 }
  0x2c   :  { %272 = vmatprep.subr.bf16.mxu0 %v351_v0 }
  0x2f   :  { %274 = vmatpush3.bf16.msra.mxu0 %v273_v31 }
  0x30   :  { %275 = vmatprep.subr.bf16.mxu0 %v351_v0 }
  0x33   :  { %277 = vmatpush3.bf16.msra.mxu0 %v276_v34 }
  0x36   :  { %252 = vmatmul.mubr.f32.vlgmr.msra.gmra.mrb[0].mxu0 %v29_v35 }
  0x99   :  { %v127_v36 = vpop.permute.xlu0 %126 }
  0x9a   :  { %vm128_vm3 = vcmp.ge.s32.totalorder %v48_v38, %v127_v36 }
  0x9d   :  { %v132_v39 = vpop.permute.xlu0 %131 }
  0x9e   :  { %vm133_vm4 = vcmp.lt.s32.totalorder %v48_v38, %v132_v39 }
  0x9f   :  { %vm134_vm5 = vmand %vm128_vm3, %vm133_vm4 }
 0x109   :  { %v115_v40 = vpop.f32.mrb[0].mxu0 }
 0x10a   :  { %v253_v41 = vpop.f32.mrb[1].mxu0  ;;  %v135_v42 = vsel %vm134_vm5, %v115_v40, -1e+30 }
 0x10b   :  { %136 = vmax.xlane.f32.xlu1 %v135_v42 }
 0x198   :  { %v137_v43 = vpop.xlane.xlu1 %136 }
 0x199   :  { %v138_v44 = vsub.f32 %v135_v42, %v137_v43  ;;  %vm162_vm6 = vcmp.ge.f32.partialorder %v135_v42, %v137_v43  ;;  %v147_v55 = vsub.f32 %v115_v40, %v137_v43 }
 0x19a   :  { %vm163_vm7 = vmand %vm134_vm5, %vm162_vm6 }
 0x19b   :  { %v139_v45 = vmul.f32 1.442695, %v138_v44  ;;  %v164_v48 = vsel %vm163_vm7, %v161_v47, 128.0 }
 0x19d   :  { %290 = vpow2.f32 %v139_v45 }
 0x1a7   :  { %v291_v46 = vpop.eup %290 }
 0x1a8   :  { %141 = vadd.xlane.f32.xlu1 %v291_v46 }
 0x1ac   :  { %165 = vmin.xlane.f32.xlu1 %v164_v48 }
 0x235   :  { %v142_v49 = vpop.xlane.xlu1 %141 }
 0x236   :  { %292 = vrcp.f32 %v142_v49 }
 0x237   :  { %294 = vlog2.f32 %v142_v49 }
 0x238   :  { %296 = vlog2.f32 %v155_v61 }
 0x239   :  { %v166_v51 = vpop.xlane.xlu1 %165 }
 0x23a   :  { %v168_v52 = vsub.f32 %v166_v51, %v167_v50 }
 0x23c   :  { %173 = vperm.xlu1 %289, %v168_v52  }
 0x240   :  { %v293_v53 = vpop.eup %292 }
 0x241   :  { %v295_v54 = vpop.eup %294  ;;  %v146_v57 = vmul.f32 %v293_v53, %v291_v46 }
 0x242   :  { %v145_v56 = vmul.f32 0.6931472, %v295_v54  ;;  %v297_v62 = vpop.eup %296 }
 0x243   :  { %v157_v63 = vmul.f32 0.6931472, %v297_v62 }
 0x244   :  { %v148_v58 = vsub.f32 %v147_v55, %v145_v56  ;;  %v169_v6 = vsub.f32 0.0, %v145_v56 }
 0x245   :  { %298 = vrcp.f32 %v157_v63 }
 0x246   :  { %v149_v59 = vmul.f32 %v148_v58, %v146_v57 }
 0x248   :  { %150 = vadd.xlane.f32.xlu0 %v149_v59 }
 0x24f   :  { %v299_v0 = vpop.eup %298 }
 0x2bb   :  { %v174_v5 = vpop.permute.xlu1 %173 }
 0x2bc   :  { %v176_v7 = vsel %vm170_vm9, %v174_v5, 0.0 }
 0x2d5   :  { %v151_v1 = vpop.xlane.xlu0 %150 }
 0x2d6   :  { %v152_v2 = vsub.f32 0.0, %v151_v1 }
 0x2d8   :  { %v159_v3 = vmul.f32 %v299_v0, %v152_v2 }
 0x2da   :  { %v160_v4 = vsel %vm154_vm8, %v159_v3, 0.0 }
 0x2db   :  { %180 = vperm.xlu1 %289, %v160_v4  }
 0x35a   :  { %v181_v8 = vpop.permute.xlu1 %180 }
 0x35b   :  { %v183_v9 = vsel %vm177_vm10, %v181_v8, %v176_v7 }
 0x35c   :  { %v185_v10 = vsel %vm184_vm11, %v169_v6, %v183_v9 }
 0x35d   :  { %186 = vst [vmem:[#allocation5] sm:$0xff] %v185_v10 }
 0x35e   :  { %333 = shalt.err (!%p330_p12)
}
 0x35f   :  { %s334_s5 = scalar_lea.hbm %s416_s3, 128 }
 0x360   :  { %p335_p13 = scmp.ne.s32.totalorder %s416_s3, %s334_s5  ;;  %p338_p0 = scmp.lt.u32.totalorder %s334_s5, %s416_s3 }
 0x362   :  { %p340_p1 = pnand %p338_p0, %p335_p13 }
 0x364   :  { %343 = shalt.err (!%p340_p1)
}
 0x365   :  { %196 = dma.vmem_to_hbm [thread:$0]  %s194_s28, 128, %s416_s3, [#allocation4]  }
 0x366   :  { %346 = dma.done.wait [#allocation4], 128  }
 0x367   :  { %347 = vsyncadd [#allocation4], 4294967168 }
 0x368   :  { %200 = vsyncpa [#allocation3], 1 }
 0x369   :  { %201 = vsyncpa [#allocation4], 1 }

</bundles_post_ra>
